<compile_context>
chip_gen: v5e
topology: v5e:2x2
jax: 0.10.0
libtpu: 0.0.40
codegen_flags: <defaults>
</compile_context>

<pallas_src>
import functools

import jax
import jax.numpy as jnp
from jax.experimental import pallas as pl
from jax.experimental.pallas import tpu as pltpu

EPS = 1e-5


def _inorm_relu(h, mask, inv_n):
    """Masked single-pass InstanceNorm1d(affine=False) + ReLU over the lane axis.

    h: (C, N_pad) f32. mask: (1, N_pad) f32 of 0/1 (or None when no padding).
    Biased variance, eps inside rsqrt (EUP), reductions on the XLU.
    """
    hm = h if mask is None else h * mask
    s = jnp.sum(hm, axis=-1, keepdims=True)
    ss = jnp.sum(hm * hm, axis=-1, keepdims=True)
    mean = s * inv_n
    var = ss * inv_n - mean * mean
    return jnp.maximum((h - mean) * jax.lax.rsqrt(var + EPS), 0.0)


def _keypoint_encoder_kernel(kpts_ref, scores_ref, *refs, tb, n_true, num_layers):
    # kpts_ref:   (TB, 2, N_pad)      scores_ref: (TB, 1, N_pad)
    # refs:       (w1, b1, ..., wL, bL, o_ref)
    #             w1 f32 (c1, 3); w_i>=2 bf16 (c_i, c_{i-1}); b_i f32 (c_i, 1)
    # o_ref:      (TB, feat, N_pad)   -- PyTorch output layout, lane-dense stores.
    o_ref = refs[-1]
    ws = [refs[2 * i][...] for i in range(num_layers)]
    bs = [refs[2 * i + 1][...] for i in range(num_layers)]

    n_pad = kpts_ref.shape[-1]
    inv_n = 1.0 / float(n_true)
    if n_pad != n_true:
        lane = jax.lax.broadcasted_iota(jnp.int32, (1, n_pad), 1)
        mask = (lane < n_true).astype(jnp.float32)
    else:
        mask = None

    w1, b1 = ws[0], bs[0]
    mm_dtype = ws[-1].dtype          # matmul operand dtype (bf16 by default)

    # Layer 1: Conv1d(3 -> c1, k=1) as three rank-1 FMAs on the VPU (a K=3 MXU
    # matmul would be >97% zero-padded), per batch element, then masked norm +
    # ReLU.  Results form one (c1, tb*N_pad) lane-slab.
    pieces = []
    for b in range(tb):              # tb <= 4 and static -> unrolled
        kb = kpts_ref[b]             # (2, N_pad)
        sc = scores_ref[b]           # (1, N_pad)
        kx = kb[0:1, :]
        ky = kb[1:2, :]
        h = kx * w1[:, 0:1] + ky * w1[:, 1:2] + sc * w1[:, 2:3] + b1   # (c1, N_pad)
        pieces.append(_inorm_relu(h, mask, inv_n))
    h = pieces[0] if tb == 1 else jnp.concatenate(pieces, axis=-1)     # (c1, tb*N)

    # Hidden layers: ONE merged MXU dot per layer per grid step (bf16 operands,
    # f32 accumulation), then per-batch masked norm + ReLU on lane-aligned slices.
    for li in range(1, num_layers - 1):
        h = jnp.dot(ws[li], h.astype(mm_dtype),
                    preferred_element_type=jnp.float32) + bs[li]       # (c_li, tb*N)
        parts = []
        for b in range(tb):
            parts.append(_inorm_relu(h[:, b * n_pad:(b + 1) * n_pad], mask, inv_n))
        h = parts[0] if tb == 1 else jnp.concatenate(parts, axis=-1)

    # Final layer: Conv1d(c_{L-1} -> feature_dim, k=1), no norm / activation.
    out = jnp.dot(ws[-1], h.astype(mm_dtype),
                  preferred_element_type=jnp.float32) + bs[-1]         # (feat, tb*N)
    for b in range(tb):              # lane-aligned (feat, N_pad) slices -> dense vst
        o_ref[b] = out[:, b * n_pad:(b + 1) * n_pad].astype(o_ref.dtype)


def _vmem_capacity_bytes():
    """Per-core VMEM capacity; conservative fallback = v7x's 64 MiB."""
    try:
        info = pltpu.get_tpu_info()
        cap = getattr(info, "vmem_capacity_bytes", None)
        if cap:
            return int(cap)
    except Exception:
        pass
    return 64 << 20


def _choose_tb(B, n_pad, channels, feat, cap_bytes):
    """Batch elements per grid step: small cap, VMEM-budgeted, divides B exactly."""
    budget = max(cap_bytes // 3, 8 << 20)
    # Rough f32 bytes per batch element: double-buffered I/O blocks + live slabs.
    per_b = 4 * n_pad * (2 * 3 + 2 * feat + 2 * sum(channels)) + 4096
    tb = max(1, min(B, 4, budget // max(per_b, 1)))   # cap ~4: per-b work >> step overhead
    if B >= 2:
        tb = max(1, min(tb, B // 2))                  # keep >= 2 grid steps (megacore)
    while B % tb:                                     # norm stats need exact rows
        tb -= 1
    return tb


def keypoint_encoder(kpts, scores, params, *, matmul_dtype=jnp.bfloat16,
                     out_dtype=jnp.float32):
    """kpts: (B, N, 2) f32, scores: (B, N) f32.

    params use PyTorch Conv1d layout: w_i (C_out, C_in), b_i (C_out,) or (C_out, 1).
    Returns (B, feature_dim, N), matching the PyTorch module.
    """
    B, N, _ = kpts.shape
    num_layers = sum(1 for k in params if k.startswith("w"))
    assert num_layers >= 2, "expected at least one hidden layer"
    channels = [params[f"w{i}"].shape[0] for i in range(1, num_layers + 1)]
    feat = channels[-1]

    n_pad = ((N + 127) // 128) * 128        # lane-dense stores / VPU tiles

    # Tiny layout plumbing (mirrors kpts.transpose(1,2) / scores.unsqueeze(1));
    # negligible vs the (B, feat, N) output traffic.
    kpts_t = jnp.transpose(kpts, (0, 2, 1)).astype(jnp.float32)        # (B, 2, N)
    scores3 = scores.reshape(B, 1, N).astype(jnp.float32)              # (B, 1, N)
    if n_pad != N:
        pad = ((0, 0), (0, 0), (0, n_pad - N))
        kpts_t = jnp.pad(kpts_t, pad)
        scores3 = jnp.pad(scores3, pad)

    # Operands: layer-1 weight + all biases stay f32 (VPU math); MXU weights bf16.
    operands = [kpts_t, scores3]
    weight_bytes = 0
    for i in range(1, num_layers + 1):
        w = params[f"w{i}"].astype(jnp.float32)
        b = params[f"b{i}"].astype(jnp.float32).reshape(w.shape[0], 1)
        if i >= 2:
            w = w.astype(matmul_dtype)
        operands += [w, b]
        weight_bytes += int(w.size) * w.dtype.itemsize + int(b.size) * 4

    cap = _vmem_capacity_bytes()
    tb = _choose_tb(B, n_pad, channels, feat, cap)
    grid = (B // tb,)

    out_itemsize = jnp.dtype(out_dtype).itemsize
    needed = (2 * tb * n_pad * 4 * 3                        # input blocks (dbl-buf)
              + 2 * tb * n_pad * feat * out_itemsize        # output block (dbl-buf)
              + 2 * tb * n_pad * 4 * 2 * max(channels)      # live activation slabs
              + tb * n_pad * 4 * sum(channels)              # headroom for temps
              + 2 * weight_bytes + (4 << 20))               # weights + compiler scratch
    vmem_limit = int(min(max(needed, 16 << 20), (cap * 5) // 8))   # 40 MiB v7x / 80 MiB v5e-v6e

    def full_spec(arr):
        nd = arr.ndim
        return pl.BlockSpec(arr.shape, lambda g, _nd=nd: (0,) * _nd)

    in_specs = [pl.BlockSpec((tb, 2, n_pad), lambda g: (g, 0, 0)),
                pl.BlockSpec((tb, 1, n_pad), lambda g: (g, 0, 0))]
    in_specs += [full_spec(op) for op in operands[2:]]

    # TODO(synk): for B == 1 on v7x, additionally tile the final layer over N so
    # both TensorCores get work; the common multi-image case is covered here.
    out = pl.pallas_call(
        functools.partial(_keypoint_encoder_kernel, tb=tb, n_true=N,
                          num_layers=num_layers),
        out_shape=jax.ShapeDtypeStruct((B, feat, n_pad), out_dtype),
        grid_spec=pltpu.PrefetchScalarGridSpec(
            num_scalar_prefetch=0,
            grid=grid,
            in_specs=in_specs,
            out_specs=pl.BlockSpec((tb, feat, n_pad), lambda g: (g, 0, 0)),
        ),
        compiler_params=pltpu.CompilerParams(
            dimension_semantics=("parallel",),
            vmem_limit_bytes=vmem_limit),
    )(*operands)

    if n_pad != N:
        out = out[:, :, :N]
    return out                                             # (B, feat, N)


def init_params(key, layers, feature_dim):
    """Deterministic synthetic init for MLP([3] + layers + [feature_dim]).

    Weights in PyTorch Conv1d layout (C_out, C_in); biases (C_out, 1).
    """
    channels = [3] + list(layers) + [feature_dim]
    keys = jax.random.split(key, 2 * (len(channels) - 1))
    params = {}
    for i in range(1, len(channels)):
        c_in, c_out = channels[i - 1], channels[i]
        w = 0.1 * jax.random.normal(keys[2 * (i - 1)], (c_out, c_in), jnp.float32)
        if i == len(channels) - 1:
            b = jnp.zeros((c_out, 1), jnp.float32)   # nn.init.constant_(last.bias, 0.)
        else:
            b = 0.1 * jax.random.normal(keys[2 * (i - 1) + 1], (c_out, 1), jnp.float32)
        params[f"w{i}"] = w
        params[f"b{i}"] = b
    return params


def reference_jax(kpts, scores, params):
    """Pure-JAX reference mirroring the PyTorch forward (f32 everywhere)."""
    num_layers = sum(1 for k in params if k.startswith("w"))
    h = jnp.concatenate([jnp.transpose(kpts, (0, 2, 1)),
                         scores[:, None, :]], axis=1)                  # (B, 3, N)

    def conv(x, w, b):
        return jnp.einsum("oi,bin->bon", w, x) + b.reshape(1, -1, 1)

    def inorm(x):
        m = x.mean(axis=-1, keepdims=True)
        v = ((x - m) ** 2).mean(axis=-1, keepdims=True)
        return (x - m) / jnp.sqrt(v + EPS)

    for i in range(1, num_layers + 1):
        h = conv(h, params[f"w{i}"], params[f"b{i}"])
        if i < num_layers:
            h = jnp.maximum(inorm(h), 0.0)
    return h                                                           # (B, feat, N)


if __name__ == "__main__":
    B, N = 2, 8
    layers = [16, 32]
    feature_dim = 32

    key = jax.random.PRNGKey(0)
    k1, k2, k3 = jax.random.split(key, 3)
    kpts = jax.random.normal(k1, (B, N, 2), jnp.float32)
    scores = jax.random.uniform(k2, (B, N), jnp.float32)
    params = init_params(k3, layers, feature_dim)

    out = keypoint_encoder(kpts, scores, params)
    out = jax.block_until_ready(out)

    ref = reference_jax(kpts, scores, params)
    assert out.shape == (B, feature_dim, N), out.shape
    # bf16 matmul operands (f32 accumulation) -> allow a bf16-level tolerance.
    err = float(jnp.max(jnp.abs(out - ref)))
    assert jnp.allclose(out, ref, atol=2e-2, rtol=2e-2), f"mismatch vs reference (max abs err {err})"

    print("KERNEL_OK")
</pallas_src>

<mosaic_0001>
module attributes {stable_mosaic.version = 11 : i64} {
  func.func @_keypoint_encoder_kernel(%arg0: i32, %arg1: memref<1x2x128xf32, #tpu.memory_space<vmem>>, %arg2: memref<1x1x128xf32, #tpu.memory_space<vmem>>, %arg3: memref<16x3xf32, #tpu.memory_space<vmem>>, %arg4: memref<16x1xf32, #tpu.memory_space<vmem>>, %arg5: memref<32x16xbf16, #tpu.memory_space<vmem>>, %arg6: memref<32x1xf32, #tpu.memory_space<vmem>>, %arg7: memref<32x32xbf16, #tpu.memory_space<vmem>>, %arg8: memref<32x1xf32, #tpu.memory_space<vmem>>, %arg9: memref<1x32x128xf32, #tpu.memory_space<vmem>>) attributes {dimension_semantics = [#tpu.dimension_semantics<parallel>], iteration_bounds = array<i64: 2>, scalar_prefetch = 0 : i64, scratch_operands = 0 : i64, tpu.core_type = #tpu.core_type<tc>, window_params = [{transform_indices = @transform_0, window_bounds = array<i64: 1, 2, 128>}, {transform_indices = @transform_1, window_bounds = array<i64: 1, 1, 128>}, {pipeline_mode = #tpu.pipeline_mode<synchronous>, transform_indices = @transform_2, window_bounds = array<i64: 16, 3>}, {pipeline_mode = #tpu.pipeline_mode<synchronous>, transform_indices = @transform_3, window_bounds = array<i64: 16, 1>}, {pipeline_mode = #tpu.pipeline_mode<synchronous>, transform_indices = @transform_4, window_bounds = array<i64: 32, 16>}, {pipeline_mode = #tpu.pipeline_mode<synchronous>, transform_indices = @transform_5, window_bounds = array<i64: 32, 1>}, {pipeline_mode = #tpu.pipeline_mode<synchronous>, transform_indices = @transform_6, window_bounds = array<i64: 32, 32>}, {pipeline_mode = #tpu.pipeline_mode<synchronous>, transform_indices = @transform_7, window_bounds = array<i64: 32, 1>}, {transform_indices = @transform_8, window_bounds = array<i64: 1, 32, 128>}]} {
    %c0 = arith.constant 0 : index
    %c0_0 = arith.constant 0 : index
    %0 = vector.load %arg3[%c0, %c0_0] : memref<16x3xf32, #tpu.memory_space<vmem>>, vector<16x3xf32>
    %c0_1 = arith.constant 0 : index
    %c0_2 = arith.constant 0 : index
    %1 = vector.load %arg5[%c0_1, %c0_2] : memref<32x16xbf16, #tpu.memory_space<vmem>>, vector<32x16xbf16>
    %c0_3 = arith.constant 0 : index
    %c0_4 = arith.constant 0 : index
    %2 = vector.load %arg7[%c0_3, %c0_4] : memref<32x32xbf16, #tpu.memory_space<vmem>>, vector<32x32xbf16>
    %c0_5 = arith.constant 0 : index
    %c0_6 = arith.constant 0 : index
    %3 = vector.load %arg4[%c0_5, %c0_6] : memref<16x1xf32, #tpu.memory_space<vmem>>, vector<16x1xf32>
    %c0_7 = arith.constant 0 : index
    %c0_8 = arith.constant 0 : index
    %4 = vector.load %arg6[%c0_7, %c0_8] : memref<32x1xf32, #tpu.memory_space<vmem>>, vector<32x1xf32>
    %c0_9 = arith.constant 0 : index
    %c0_10 = arith.constant 0 : index
    %5 = vector.load %arg8[%c0_9, %c0_10] : memref<32x1xf32, #tpu.memory_space<vmem>>, vector<32x1xf32>
    %6 = tpu.iota {dimensions = array<i32: 1>} : vector<1x128xi32>
    %c8_i32 = arith.constant 8 : i32
    %7 = vector.broadcast %c8_i32 : i32 to vector<1x128xi32>
    %8 = arith.cmpi slt, %6, %7 : vector<1x128xi32>
    %9 = arith.extui %8 : vector<1x128xi1> to vector<1x128xi32>
    %10 = arith.sitofp %9 : vector<1x128xi32> to vector<1x128xf32>
    %c0_11 = arith.constant 0 : index
    %c0_12 = arith.constant 0 : index
    %c0_13 = arith.constant 0 : index
    %11 = vector.load %arg1[%c0_11, %c0_12, %c0_13] : memref<1x2x128xf32, #tpu.memory_space<vmem>>, vector<1x2x128xf32>
    %12 = vector.shape_cast %11 : vector<1x2x128xf32> to vector<2x128xf32>
    %c0_14 = arith.constant 0 : index
    %c0_15 = arith.constant 0 : index
    %c0_16 = arith.constant 0 : index
    %13 = vector.load %arg2[%c0_14, %c0_15, %c0_16] : memref<1x1x128xf32, #tpu.memory_space<vmem>>, vector<1x1x128xf32>
    %14 = vector.shape_cast %13 : vector<1x1x128xf32> to vector<1x128xf32>
    %15 = vector.extract_strided_slice %12 {offsets = [0, 0], sizes = [1, 128], strides = [1, 1]} : vector<2x128xf32> to vector<1x128xf32>
    %16 = vector.extract_strided_slice %12 {offsets = [1, 0], sizes = [1, 128], strides = [1, 1]} : vector<2x128xf32> to vector<1x128xf32>
    %17 = vector.extract_strided_slice %0 {offsets = [0, 0], sizes = [16, 1], strides = [1, 1]} : vector<16x3xf32> to vector<16x1xf32>
    %18 = vector.broadcast %15 : vector<1x128xf32> to vector<16x128xf32>
    %19 = vector.broadcast %17 : vector<16x1xf32> to vector<16x128xf32>
    %20 = arith.mulf %18, %19 : vector<16x128xf32>
    %21 = vector.extract_strided_slice %0 {offsets = [0, 1], sizes = [16, 1], strides = [1, 1]} : vector<16x3xf32> to vector<16x1xf32>
    %22 = vector.broadcast %16 : vector<1x128xf32> to vector<16x128xf32>
    %23 = vector.broadcast %21 : vector<16x1xf32> to vector<16x128xf32>
    %24 = arith.mulf %22, %23 : vector<16x128xf32>
    %25 = arith.addf %20, %24 : vector<16x128xf32>
    %26 = vector.extract_strided_slice %0 {offsets = [0, 2], sizes = [16, 1], strides = [1, 1]} : vector<16x3xf32> to vector<16x1xf32>
    %27 = vector.broadcast %14 : vector<1x128xf32> to vector<16x128xf32>
    %28 = vector.broadcast %26 : vector<16x1xf32> to vector<16x128xf32>
    %29 = arith.mulf %27, %28 : vector<16x128xf32>
    %30 = arith.addf %25, %29 : vector<16x128xf32>
    %31 = vector.broadcast %3 : vector<16x1xf32> to vector<16x128xf32>
    %32 = arith.addf %30, %31 : vector<16x128xf32>
    %33 = vector.broadcast %10 : vector<1x128xf32> to vector<16x128xf32>
    %34 = arith.mulf %32, %33 : vector<16x128xf32>
    %cst = arith.constant dense<0.000000e+00> : vector<16xf32>
    %35 = vector.multi_reduction <add>, %34, %cst [1] : vector<16x128xf32> to vector<16xf32>
    %36 = vector.shape_cast %35 : vector<16xf32> to vector<16x1xf32>
    %37 = arith.mulf %34, %34 : vector<16x128xf32>
    %cst_17 = arith.constant dense<0.000000e+00> : vector<16xf32>
    %38 = vector.multi_reduction <add>, %37, %cst_17 [1] : vector<16x128xf32> to vector<16xf32>
    %39 = vector.shape_cast %38 : vector<16xf32> to vector<16x1xf32>
    %cst_18 = arith.constant 1.250000e-01 : f32
    %40 = vector.broadcast %cst_18 : f32 to vector<16x1xf32>
    %41 = arith.mulf %36, %40 : vector<16x1xf32>
    %cst_19 = arith.constant 1.250000e-01 : f32
    %42 = vector.broadcast %cst_19 : f32 to vector<16x1xf32>
    %43 = arith.mulf %39, %42 : vector<16x1xf32>
    %44 = arith.mulf %41, %41 : vector<16x1xf32>
    %45 = arith.subf %43, %44 : vector<16x1xf32>
    %46 = vector.broadcast %41 : vector<16x1xf32> to vector<16x128xf32>
    %47 = arith.subf %32, %46 : vector<16x128xf32>
    %cst_20 = arith.constant 9.99999974E-6 : f32
    %48 = vector.broadcast %cst_20 : f32 to vector<16x1xf32>
    %49 = arith.addf %45, %48 : vector<16x1xf32>
    %50 = math.rsqrt %49 : vector<16x1xf32>
    %51 = vector.broadcast %50 : vector<16x1xf32> to vector<16x128xf32>
    %52 = arith.mulf %47, %51 : vector<16x128xf32>
    %cst_21 = arith.constant 0.000000e+00 : f32
    %53 = vector.broadcast %cst_21 : f32 to vector<16x128xf32>
    %54 = arith.maximumf %52, %53 : vector<16x128xf32>
    %55 = arith.truncf %54 : vector<16x128xf32> to vector<16x128xbf16>
    %cst_22 = arith.constant dense<0.000000e+00> : vector<32x128xf32>
    %56 = tpu.matmul %1, %55, %cst_22 {dimension_numbers = #tpu.dot_dimension_numbers<[1], [0], [0], [1], [0, 0, 1, 1], [], []>} : vector<32x16xbf16>, vector<16x128xbf16>, vector<32x128xf32> -> vector<32x128xf32>
    %57 = vector.broadcast %4 : vector<32x1xf32> to vector<32x128xf32>
    %58 = arith.addf %56, %57 : vector<32x128xf32>
    %59 = vector.broadcast %10 : vector<1x128xf32> to vector<32x128xf32>
    %60 = arith.mulf %58, %59 : vector<32x128xf32>
    %cst_23 = arith.constant dense<0.000000e+00> : vector<32xf32>
    %61 = vector.multi_reduction <add>, %60, %cst_23 [1] : vector<32x128xf32> to vector<32xf32>
    %62 = vector.shape_cast %61 : vector<32xf32> to vector<32x1xf32>
    %63 = arith.mulf %60, %60 : vector<32x128xf32>
    %cst_24 = arith.constant dense<0.000000e+00> : vector<32xf32>
    %64 = vector.multi_reduction <add>, %63, %cst_24 [1] : vector<32x128xf32> to vector<32xf32>
    %65 = vector.shape_cast %64 : vector<32xf32> to vector<32x1xf32>
    %cst_25 = arith.constant 1.250000e-01 : f32
    %66 = vector.broadcast %cst_25 : f32 to vector<32x1xf32>
    %67 = arith.mulf %62, %66 : vector<32x1xf32>
    %cst_26 = arith.constant 1.250000e-01 : f32
    %68 = vector.broadcast %cst_26 : f32 to vector<32x1xf32>
    %69 = arith.mulf %65, %68 : vector<32x1xf32>
    %70 = arith.mulf %67, %67 : vector<32x1xf32>
    %71 = arith.subf %69, %70 : vector<32x1xf32>
    %72 = vector.broadcast %67 : vector<32x1xf32> to vector<32x128xf32>
    %73 = arith.subf %58, %72 : vector<32x128xf32>
    %cst_27 = arith.constant 9.99999974E-6 : f32
    %74 = vector.broadcast %cst_27 : f32 to vector<32x1xf32>
    %75 = arith.addf %71, %74 : vector<32x1xf32>
    %76 = math.rsqrt %75 : vector<32x1xf32>
    %77 = vector.broadcast %76 : vector<32x1xf32> to vector<32x128xf32>
    %78 = arith.mulf %73, %77 : vector<32x128xf32>
    %cst_28 = arith.constant 0.000000e+00 : f32
    %79 = vector.broadcast %cst_28 : f32 to vector<32x128xf32>
    %80 = arith.maximumf %78, %79 : vector<32x128xf32>
    %81 = arith.truncf %80 : vector<32x128xf32> to vector<32x128xbf16>
    %cst_29 = arith.constant dense<0.000000e+00> : vector<32x128xf32>
    %82 = tpu.matmul %2, %81, %cst_29 {dimension_numbers = #tpu.dot_dimension_numbers<[1], [0], [0], [1], [0, 0, 1, 1], [], []>} : vector<32x32xbf16>, vector<32x128xbf16>, vector<32x128xf32> -> vector<32x128xf32>
    %83 = vector.broadcast %5 : vector<32x1xf32> to vector<32x128xf32>
    %84 = arith.addf %82, %83 : vector<32x128xf32>
    %c0_30 = arith.constant 0 : index
    %c0_31 = arith.constant 0 : index
    %c0_32 = arith.constant 0 : index
    %85 = vector.load %arg9[%c0_30, %c0_31, %c0_32] : memref<1x32x128xf32, #tpu.memory_space<vmem>>, vector<1x32x128xf32>
    %86 = vector.shape_cast %85 : vector<1x32x128xf32> to vector<32x128xf32>
    %87 = vector.shape_cast %84 : vector<32x128xf32> to vector<1x32x128xf32>
    tpu.vector_store %arg9[%c0_30, %c0_31, %c0_32], %87 {strides = array<i32>} : memref<1x32x128xf32, #tpu.memory_space<vmem>>, vector<1x32x128xf32>,
    return
  }
  func.func @transform_0(%arg0: i32) -> (i32, i32, i32) {
    %c0_i32 = arith.constant 0 : i32
    %c0_i32_0 = arith.constant 0 : i32
    %c0_i32_1 = arith.constant 0 : i32
    return %arg0, %c0_i32, %c0_i32_0 : i32, i32, i32
  }
  func.func @transform_1(%arg0: i32) -> (i32, i32, i32) {
    %c0_i32 = arith.constant 0 : i32
    %c0_i32_0 = arith.constant 0 : i32
    %c0_i32_1 = arith.constant 0 : i32
    return %arg0, %c0_i32, %c0_i32_0 : i32, i32, i32
  }
  func.func @transform_2(%arg0: i32) -> (i32, i32) {
    %c0_i32 = arith.constant 0 : i32
    %c0_i32_0 = arith.constant 0 : i32
    %c0_i32_1 = arith.constant 0 : i32
    return %c0_i32, %c0_i32_0 : i32, i32
  }
  func.func @transform_3(%arg0: i32) -> (i32, i32) {
    %c0_i32 = arith.constant 0 : i32
    %c0_i32_0 = arith.constant 0 : i32
    %c0_i32_1 = arith.constant 0 : i32
    return %c0_i32, %c0_i32_0 : i32, i32
  }
  func.func @transform_4(%arg0: i32) -> (i32, i32) {
    %c0_i32 = arith.constant 0 : i32
    %c0_i32_0 = arith.constant 0 : i32
    %c0_i32_1 = arith.constant 0 : i32
    return %c0_i32, %c0_i32_0 : i32, i32
  }
  func.func @transform_5(%arg0: i32) -> (i32, i32) {
    %c0_i32 = arith.constant 0 : i32
    %c0_i32_0 = arith.constant 0 : i32
    %c0_i32_1 = arith.constant 0 : i32
    return %c0_i32, %c0_i32_0 : i32, i32
  }
  func.func @transform_6(%arg0: i32) -> (i32, i32) {
    %c0_i32 = arith.constant 0 : i32
    %c0_i32_0 = arith.constant 0 : i32
    %c0_i32_1 = arith.constant 0 : i32
    return %c0_i32, %c0_i32_0 : i32, i32
  }
  func.func @transform_7(%arg0: i32) -> (i32, i32) {
    %c0_i32 = arith.constant 0 : i32
    %c0_i32_0 = arith.constant 0 : i32
    %c0_i32_1 = arith.constant 0 : i32
    return %c0_i32, %c0_i32_0 : i32, i32
  }
  func.func @transform_8(%arg0: i32) -> (i32, i32, i32) {
    %c0_i32 = arith.constant 0 : i32
    %c0_i32_0 = arith.constant 0 : i32
    %c0_i32_1 = arith.constant 0 : i32
    return %arg0, %c0_i32, %c0_i32_0 : i32, i32, i32
  }
}

</mosaic_0001>

<bundles_post_ra>
// kernel: tpu_custom_call.1
= control target key start
LH: loop header
LB: loop body
LE: loop exit
PB: predicated region body
PF: predicated region fallthrough
CT: control target
= control target key end

     0   :  { %13 = vsyncpa [#allocation3], 0  ;;  %s1134_s0 = inlined_call_operand.vmem [shape: f32[2,2,128], index: 0, kind: input, shape index: {}]   ;;  %s1135_s1 = inlined_call_operand.vmem [shape: f32[2,1,128], index: 1, kind: input, shape index: {}]   ;;  %s1136_s2 = inlined_call_operand.vmem [shape: f32[16,3], index: 2, kind: input, shape index: {}]   ;;  %s1137_s3 = inlined_call_operand.vmem [shape: f32[16,1], index: 3, kind: input, shape index: {}]   ;;  %s1138_s4 = inlined_call_operand.vmem [shape: bf16[32,16], index: 4, kind: input, shape index: {}]   ;;  %s1139_s5 = inlined_call_operand.vmem [shape: f32[32,1], index: 5, kind: input, shape index: {}]   ;;  %s1140_s6 = inlined_call_operand.vmem [shape: bf16[32,32], index: 6, kind: input, shape index: {}]   ;;  %s1141_s7 = inlined_call_operand.vmem [shape: f32[32,1], index: 7, kind: input, shape index: {}]   ;;  %s1142_s8 = inlined_call_operand.hbm [shape: f32[2,32,128], index: 8, kind: output, shape index: {}]  }
   0x1   :  { %15 = vsyncpa [#allocation3 + $0x1], 0  ;;  %s964_s27 = smov 0   ;;  %s966_s28 = smov 0  }
   0x2   :  { %s968_s29 = smov 0   ;;  %s970_s30 = smov 0  }
   0x3 LB: > { %s985_s9 = sadd.s32 4294967295, %s911_s30   ;;  %s746_s10 = sadd.s32 4294967294, %s911_s30   ;;  %s911_s30 = sphi %s970_s30, %s1148_s30   ;;  %s907_s29 = sphi %s968_s29, %s1147_s29   ;;  %s903_s28 = sphi %s966_s28, %s1146_s28   ;;  %s899_s27 = sphi %s964_s27, %s1145_s27  }
   0x4   : > { %s989_s11 = sadd.s32 1, %s911_s30   ;;  %s206_s12 = sadd.s32 1, %s907_s29 }
   0x5   : > { %s203_s13 = ssub.s32 %s911_s30, %s989_s11  ;;  %p216_p0 = scmp.ne.s32.totalorder %s907_s29, %s903_s28 }
   0x6   : > { %p204_p1 = scmp.eq.s32.totalorder %s203_s13, 0  ;;  %p217_p2 = scmp.eq.s32.totalorder %s985_s9, 1 }
   0x7   : > { %p222_p3 = scmp.ne.s32.totalorder %s903_s28, %s899_s27  ;;  %p223_p4 = scmp.eq.s32.totalorder %s746_s10, 1 }
   0x8   : > { %s1000_s14 = scalar_select %p204_p1, %s907_s29, %s206_s12  }
   0x9   : > { %p1002_p5 = por %p217_p2, %p216_p0  ;;  %p1006_p6 = por %p223_p4, %p222_p3 }
   0xa   : > { %p749_p7 = scmp.ge.s32.totalorder %s911_s30, 1  ;;  %p272_p8 = scmp.lt.s32.totalorder %s911_s30, 3 }
   0xc   : > { %p273_p9 = pnand %p749_p7, %p272_p8 }
   0xd   : > { %p308_p10 = scmp.lt.s32.totalorder (!%p273_p9), %s985_s9, 1  ;;  %s305_s18 = sand.u32 (!%p273_p9), 1, %s903_s28  }
   0xe   : > { %276 = sbr.rel (%p273_p9) target bundleno = 762 (0x2fa), region = 52  ;;  %s782_s21 = sshll.u32 (!%p273_p9), %s985_s9, 5 }
   0xf   : > { %s671_s24 = scalar_lea.hbm (!%p273_p9), %s1142_s8, %s782_s21 }
  0x10   : > { %s674_s26 = sshll.u32 (!%p273_p9), %s671_s24, 4  ;;  %s675_s26 = int_to_ptr.hbm [resolvable:$true] %s674_s26 }
  0x11   : > { %s863_s10 = sshra.s32 (!%p273_p9), %s675_s26, 4  ;;  %s864_s10 = int_to_ptr.hbm [resolvable:$true] %s863_s10 }
  0x12   : > { %s865_s12 = scalar_lea.hbm (!%p273_p9), %s864_s10, 32  ;;  %p870_p0 = scmp.lt.s32.totalorder (!%p273_p9), %s864_s10, %s1142_s8 }
  0x13   : > { %v316_v0 = vld [vmem:[%s1136_s2] sm:$0xff]  ;;  %v913_v1 = vmov 1   ;;  %v914_v2 = vmov 0   ;;  %v915_v3 = vmov 2   ;;  %s309_s19 = scalar_select %p308_p10, %s985_s9, 1  ;;  %v317_v4 = vld [vmem:[%s1136_s2 + $0x8] sm:$0xff]  ;;  %v336_v13 = vlaneseq }
  0x14   : > { %832 = vset.pattern.permute.xlu1 %v913_v1  ;;  %831 = vset.pattern.permute.xlu0 %v914_v2  ;;  %v326_v5 = vld [vmem:[%s1137_s3] sm:$0xff]  ;;  %v327_v6 = vld [vmem:[%s1137_s3 + $0x8] sm:$0xff]  ;;  %v916_v30 = vmov 0.0   ;;  %v331_v39 = vld [vmem:[%s1139_s5 + $0x18] sm:$0xff]  ;;  %vm475_vm7 = vcmask 130048   ;;  %s660_s9 = scalar_lea.sflag [#allocation3], %s305_s18  ;;  %p866_p11 = scmp.ne.s32.totalorder %s864_s10, %s865_s12 }
  0x15   : > { %358 = vperm.xlu1 %832, %v316_v0   ;;  %346 = vperm.xlu0 %831, %v316_v0   ;;  %s314_s22 = scalar_lea.vmem %s1135_s1, %s309_s19  ;;  %s751_s13 = sshll.u32 %s309_s19, 1  ;;  %v337_v22 = vand.u32 127, %v336_v13  ;;  %v328_v40 = vld [vmem:[%s1139_s5] sm:$0xff]  ;;  %v329_v41 = vld [vmem:[%s1139_s5 + $0x8] sm:$0xff]  ;;  %v330_v54 = vld [vmem:[%s1139_s5 + $0x10] sm:$0xff] }
  0x16   : > { %833 = vset.pattern.permute.xlu2 %v915_v3  ;;  %s311_s20 = scalar_lea.vmem %s1134_s0, %s751_s13  ;;  %v836_v16 = vld [vmem:[%s314_s22] ss:$0 sm:$0xff]  ;;  %p867_p12 = pnand %p866_p11, %p1002_p5 }
  0x17   : > { %373 = vperm.xlu2 %833, %v316_v0   ;;  %v341_v9 = vld [vmem:[%s311_s20] sm:$0x3]  ;;  %vm338_vm0 = vcmp.lt.s32.totalorder %v337_v22, 8  ;;  %s750_s20 = sshll.u32 %s305_s18, 5 }
  0x18   : > { %v356_v11 = vperm.slane %v341_v9, 1  ;;  %v343_v12 = vperm.slane %v341_v9, 0  ;;  %v1032_v31 = vsel %vm338_vm0, 1.0, %v916_v30  ;;  %s307_s19 = scalar_lea.vmem [#allocation2], %s750_s20  ;;  %p868_p13 = pneg %p867_p12 }
  0x19   : > { %s672_s25 = sshll.u32 %s307_s19, 4  ;;  %s869_s20 = scalar_lea.hbm %s1142_s8, 64  ;;  %s673_s25 = int_to_ptr.vmem [resolvable:$true] %s672_s25 }
  0x1a   : > { %p871_p1 = scmp.lt.s32.totalorder %s869_s20, %s865_s12 }
  0x1c   : > { %p872_p2 = por %p871_p1, %p870_p0 }
  0x1d   : > { %362 = vperm.xlu1 %832, %v317_v4   ;;  %351 = vperm.xlu0 %831, %v317_v4  }
  0x1e   : > { %p873_p3 = pnand %p872_p2, %p868_p13 }
  0x1f   : > { %377 = vperm.xlu2 %833, %v317_v4  }
  0x25   : > { %834 = vset.pattern.permute.xlu1 %v914_v2  ;;  %386 = vperm.xlu0 %831, %v326_v5  }
  0x26   : > { %391 = vperm.xlu1 %834, %v327_v6  }
  0x27   : > { %835 = vset.pattern.permute.xlu2 %v914_v2 }
  0x71   : > { %v374_v7 = vpop.permute.xlu2 %373 }
  0x72   : > { %v380_v24 = vmul.f32 %v836_v16, %v374_v7 }
  0x79   : > { %v378_v21 = vpop.permute.xlu2 %377 }
  0x7a   : > { %v381_v26 = vmul.f32 %v836_v16, %v378_v21 }
  0x87   : > { %v359_v8 = vpop.permute.xlu1 %358  ;;  %v347_v10 = vpop.permute.xlu0 %346 }
  0x88   : > { %v365_v14 = vmul.f32 %v359_v8, %v356_v11  ;;  %v354_v15 = vmul.f32 %v347_v10, %v343_v12 }
  0x8a   : > { %v367_v23 = vadd.f32 %v365_v14, %v354_v15  ;;  %v778_v14 = vld [vmem:[%s1138_s4] sm:$0xff]  ;;  %v779_v15 = vld [vmem:[%s1138_s4 + $0x8] sm:$0xff] }
  0x8c   : > { %v382_v27 = vadd.f32 %v380_v24, %v367_v23 }
  0x8f   : > { %v363_v17 = vpop.permute.xlu1 %362  ;;  %v352_v18 = vpop.permute.xlu0 %351 }
  0x90   : > { %v366_v19 = vmul.f32 %v363_v17, %v356_v11  ;;  %v355_v20 = vmul.f32 %v352_v18, %v343_v12 }
  0x92   : > { %v368_v25 = vadd.f32 %v366_v19, %v355_v20 }
  0x94   : > { %v383_v29 = vadd.f32 %v381_v26, %v368_v25 }
  0x97   : > { %v387_v28 = vpop.permute.xlu0 %386 }
  0x98   : > { %v394_v32 = vadd.f32 %v387_v28, %v382_v27  ;;  %v392_v33 = vpop.permute.xlu1 %391 }
  0x99   : > { %v395_v34 = vadd.f32 %v392_v33, %v383_v29 }
  0x9a   : > { %v396_v35 = vmul.f32 %v1032_v31, %v394_v32 }
  0x9b   : > { %v397_v36 = vmul.f32 %v1032_v31, %v395_v34 }
  0x9c   : > { %398 = vadd.xlane.f32.xlu2 %v396_v35  ;;  %v402_v37 = vmul.f32 %v396_v35, %v396_v35 }
  0x9d   : > { %400 = vadd.xlane.f32.xlu0 %v397_v36  ;;  %v403_v38 = vmul.f32 %v397_v36, %v397_v36 }
  0x9e   : > { %404 = vadd.xlane.f32.xlu1 %v402_v37  ;;  %v332_v37 = vld [vmem:[%s1141_s7] sm:$0xff] }
  0xa4   : > { %406 = vadd.xlane.f32.xlu2 %v403_v38  ;;  %v335_v38 = vld [vmem:[%s1141_s7 + $0x18] sm:$0xff] }
  0xb1   : > { %462 = vperm.xlu0 %831, %v331_v39   ;;  %v333_v39 = vld [vmem:[%s1141_s7 + $0x8] sm:$0xff] }
  0xb7   : > { %447 = vperm.xlu1 %834, %v328_v40  }
  0xb9   : > { %452 = vperm.xlu0 %831, %v329_v41  }
  0xbc   : > { %457 = vperm.xlu2 %835, %v330_v54  }
 0x10f   : > { %v399_v42 = vpop.xlane.xlu2 %398 }
 0x110   : > { %v408_v43 = vmul.f32 0.125, %v399_v42  ;;  %v401_v44 = vpop.xlane.xlu0 %400 }
 0x111   : > { %v405_v45 = vpop.xlane.xlu1 %404  ;;  %v409_v48 = vmul.f32 0.125, %v401_v44 }
 0x112   : > { %v412_v46 = vmul.f32 %v408_v43, %v408_v43  ;;  %v410_v47 = vmul.f32 0.125, %v405_v45  ;;  %v416_v5 = vsub.f32 %v394_v32, %v408_v43 }
 0x113   : > { %v413_v52 = vmul.f32 %v409_v48, %v409_v48  ;;  %v417_v7 = vsub.f32 %v395_v34, %v409_v48 }
 0x114   : > { %v414_v49 = vsub.f32 %v410_v47, %v412_v46 }
 0x116   : > { %v418_v50 = vadd.f32 1e-05, %v414_v49 }
 0x117   : > { %v407_v51 = vpop.xlane.xlu2 %406 }
 0x118   : > { %837 = vrsqrt.f32 %v418_v50  ;;  %v411_v53 = vmul.f32 0.125, %v407_v51  ;;  %vm426_vm2 = vweird.f32 %v418_v50 }
 0x11a   : > { %v415_v55 = vsub.f32 %v411_v53, %v413_v52 }
 0x11c   : > { %v419_v56 = vadd.f32 1e-05, %v415_v55 }
 0x11e   : > { %v838_v57 = vpop.eup %837  ;;  %839 = vrsqrt.f32 %v419_v56  ;;  %vm436_vm5 = vweird.f32 %v419_v56 }
 0x11f   : > { %v421_v58 = vmul.f32 %v838_v57, %v418_v50  ;;  %vm427_vm1 = vweird.f32 %v838_v57  ;;  %v458_v21 = vpop.permute.xlu2 %457 }
 0x120   : > { %vm428_vm3 = vmor %vm426_vm2, %vm427_vm1 }
 0x121   : > { %v422_v59 = vmul.f32 %v838_v57, %v421_v58 }
 0x123   : > { %v423_v60 = vmul.f32 0.5, %v422_v59  ;;  %v463_v20 = vpop.permute.xlu0 %462 }
 0x124   : > { %v840_v61 = vpop.eup %839 }
 0x125   : > { %v424_v62 = vsub.f32 1.5, %v423_v60  ;;  %v431_v63 = vmul.f32 %v840_v61, %v419_v56  ;;  %vm437_vm4 = vweird.f32 %v840_v61 }
 0x126   : > { %vm438_vm6 = vmor %vm436_vm5, %vm437_vm4  ;;  %vm629_vm4 = vcmask 261120  }
 0x127   : > { %v432_v0 = vmul.f32 %v840_v61, %v431_v63  ;;  %v425_v1 = vmul.f32 %v838_v57, %v424_v62 }
 0x129   : > { %v433_v2 = vmul.f32 0.5, %v432_v0  ;;  %v429_v4 = vsel %vm428_vm3, %v838_v57, %v425_v1  ;;  %v448_v16 = vpop.permute.xlu1 %447 }
 0x12a   : > { %v440_v8 = vmul.f32 %v429_v4, %v416_v5 }
 0x12b   : > { %v434_v3 = vsub.f32 1.5, %v433_v2  ;;  %v453_v27 = vpop.permute.xlu0 %452 }
 0x12c   : > { %v442_v11 = vmax.f32 %v440_v8, 0.0 }
 0x12d   : > { %v435_v6 = vmul.f32 %v840_v61, %v434_v3 }
 0x12f   : > { %v439_v9 = vsel %vm438_vm6, %v840_v61, %v435_v6 }
 0x130   : > { %v441_v10 = vmul.f32 %v439_v9, %v417_v7 }
 0x132   : > { %v443_v12 = vmax.f32 %v441_v10, 0.0 }
 0x134   : > { %v444_v13 = vpack.c.bf16 %v443_v12, %v442_v11 }
 0x136   : > { %489 = vmatpush.bf16.msra.mxu0 %v444_v13  ;;  %783 = vmatpush.bf16.msra.mxu3 %v444_v13 }
 0x139   : > { %761 = vmatmul.msk.bf16.vlgmr.msra.gmra.mxu0 %vm475_vm7, %v778_v14  ;;  %762 = vmatmul.msk.bf16.vlgmr.msra.gmra.mxu3 %vm475_vm7, %v779_v15 }
 0x1b6   : > { %v491_v17 = vpop.f32.mrf.mxu0 }
 0x1b7   : > { %v1054_v18 = vadd.f32 %v491_v17, %v448_v16 }
 0x1b9   : > { %v501_v19 = vmul.f32 %v1032_v31, %v1054_v18 }
 0x1bb   : > { %505 = vadd.xlane.f32.xlu1 %v501_v19  ;;  %v513_v36 = vmul.f32 %v501_v19, %v501_v19 }
 0x1bc   : > { %v496_v22 = vpop.f32.mrf.mxu3 }
 0x1bd   : > { %v1058_v23 = vadd.f32 %v496_v22, %v458_v21 }
 0x1be   : > { %v493_v26 = vpop.f32.mrf.mxu0 }
 0x1bf   : > { %v503_v24 = vmul.f32 %v1032_v31, %v1058_v23  ;;  %v1062_v29 = vadd.f32 %v493_v26, %v453_v27 }
 0x1c1   : > { %509 = vadd.xlane.f32.xlu2 %v503_v24  ;;  %v515_v25 = vmul.f32 %v503_v24, %v503_v24  ;;  %v502_v34 = vmul.f32 %v1032_v31, %v1062_v29 }
 0x1c3   : > { %521 = vadd.xlane.f32.xlu0 %v515_v25  ;;  %v514_v35 = vmul.f32 %v502_v34, %v502_v34 }
 0x1c4   : > { %v498_v28 = vpop.f32.mrf.mxu3 }
 0x1c5   : > { %v1064_v30 = vadd.f32 %v498_v28, %v463_v20 }
 0x1c7   : > { %v504_v32 = vmul.f32 %v1032_v31, %v1064_v30  ;;  %v334_v31 = vld [vmem:[%s1141_s7 + $0x10] sm:$0xff] }
 0x1c9   : > { %511 = vadd.xlane.f32.xlu1 %v504_v32  ;;  %v516_v33 = vmul.f32 %v504_v32, %v504_v32 }
 0x1cb   : > { %523 = vadd.xlane.f32.xlu2 %v516_v33  ;;  %507 = vadd.xlane.f32.xlu0 %v502_v34 }
 0x1d1   : > { %519 = vadd.xlane.f32.xlu1 %v514_v35 }
 0x1d3   : > { %517 = vadd.xlane.f32.xlu2 %v513_v36 }
 0x1df   : > { %601 = vperm.xlu0 %831, %v332_v37  }
 0x1e7   : > { %616 = vperm.xlu0 %831, %v335_v38  }
 0x1ea   : > { %611 = vperm.xlu1 %834, %v334_v31  }
 0x1eb   : > { %606 = vperm.xlu2 %835, %v333_v39  }
 0x22e   : > { %v506_v40 = vpop.xlane.xlu1 %505 }
 0x22f   : > { %v1084_v57 = vmul.f32 0.125, %v506_v40 }
 0x231   : > { %v533_v1 = vmul.f32 %v1084_v57, %v1084_v57 }
 0x234   : > { %v510_v41 = vpop.xlane.xlu2 %509 }
 0x235   : > { %v527_v42 = vmul.f32 0.125, %v510_v41  ;;  %v541_v41 = vsub.f32 %v1054_v18, %v1084_v57 }
 0x236   : > { %v522_v43 = vpop.xlane.xlu0 %521 }
 0x237   : > { %v535_v44 = vmul.f32 %v527_v42, %v527_v42  ;;  %v531_v45 = vmul.f32 0.125, %v522_v43  ;;  %v543_v20 = vsub.f32 %v1058_v23, %v527_v42 }
 0x239   : > { %v539_v46 = vsub.f32 %v531_v45, %v535_v44 }
 0x23b   : > { %v547_v47 = vadd.f32 1e-05, %v539_v46 }
 0x23c   : > { %v512_v48 = vpop.xlane.xlu1 %511 }
 0x23d   : > { %841 = vrsqrt.f32 %v547_v47  ;;  %v528_v49 = vmul.f32 0.125, %v512_v48  ;;  %vm575_vm9 = vweird.f32 %v547_v47  ;;  %v781_v48 = vld [vmem:[%s1140_s6 + $0x8] sm:$0xff] }
 0x23e   : > { %v524_v50 = vpop.xlane.xlu2 %523  ;;  %v508_v51 = vpop.xlane.xlu0 %507 }
 0x23f   : > { %v536_v52 = vmul.f32 %v528_v49, %v528_v49  ;;  %v532_v53 = vmul.f32 0.125, %v524_v50  ;;  %v1082_v55 = vmul.f32 0.125, %v508_v51  ;;  %v544_v25 = vsub.f32 %v1064_v30, %v528_v49 }
 0x241   : > { %v540_v54 = vsub.f32 %v532_v53, %v536_v52  ;;  %v534_v61 = vmul.f32 %v1082_v55, %v1082_v55  ;;  %v542_v31 = vsub.f32 %v1062_v29, %v1082_v55  ;;  %v780_v29 = vld [vmem:[%s1140_s6] sm:$0xff] }
 0x243   : > { %v842_v56 = vpop.eup %841  ;;  %v548_v58 = vadd.f32 1e-05, %v540_v54 }
 0x244   : > { %v570_v59 = vmul.f32 %v842_v56, %v547_v47  ;;  %v520_v60 = vpop.xlane.xlu1 %519  ;;  %vm576_vm8 = vweird.f32 %v842_v56 }
 0x245   : > { %843 = vrsqrt.f32 %v548_v58  ;;  %v530_v62 = vmul.f32 0.125, %v520_v60  ;;  %vm577_vm10 = vmor %vm575_vm9, %vm576_vm8  ;;  %vm585_vm12 = vweird.f32 %v548_v58 }
 0x246   : > { %v571_v63 = vmul.f32 %v842_v56, %v570_v59  ;;  %v518_v0 = vpop.xlane.xlu2 %517 }
 0x247   : > { %v538_v2 = vsub.f32 %v530_v62, %v534_v61  ;;  %v529_v3 = vmul.f32 0.125, %v518_v0 }
 0x248   : > { %v572_v4 = vmul.f32 0.5, %v571_v63 }
 0x249   : > { %v546_v5 = vadd.f32 1e-05, %v538_v2  ;;  %v537_v6 = vsub.f32 %v529_v3, %v533_v1 }
 0x24a   : > { %v573_v7 = vsub.f32 1.5, %v572_v4 }
 0x24b   : > { %v844_v8 = vpop.eup %843  ;;  %845 = vrsqrt.f32 %v546_v5  ;;  %v545_v9 = vadd.f32 1e-05, %v537_v6  ;;  %vm565_vm15 = vweird.f32 %v546_v5 }
 0x24c   : > { %v580_v10 = vmul.f32 %v844_v8, %v548_v58  ;;  %v574_v12 = vmul.f32 %v842_v56, %v573_v7  ;;  %vm586_vm11 = vweird.f32 %v844_v8 }
 0x24d   : > { %847 = vrsqrt.f32 %v545_v9  ;;  %vm587_vm13 = vmor %vm585_vm12, %vm586_vm11  ;;  %vm555_vm2 = vweird.f32 %v545_v9 }
 0x24e   : > { %v581_v11 = vmul.f32 %v844_v8, %v580_v10  ;;  %v578_v17 = vsel %vm577_vm10, %v842_v56, %v574_v12  ;;  %v607_v54 = vpop.permute.xlu2 %606 }
 0x24f   : > { %v591_v26 = vmul.f32 %v578_v17, %v543_v20 }
 0x250   : > { %v582_v13 = vmul.f32 0.5, %v581_v11 }
 0x251   : > { %v846_v14 = vpop.eup %845  ;;  %v595_v36 = vmax.f32 %v591_v26, 0.0  ;;  %v602_v18 = vpop.permute.xlu0 %601 }
 0x252   : > { %v583_v15 = vsub.f32 1.5, %v582_v13  ;;  %v560_v16 = vmul.f32 %v846_v14, %v546_v5  ;;  %vm566_vm14 = vweird.f32 %v846_v14 }
 0x253   : > { %v848_v19 = vpop.eup %847  ;;  %vm567_vm1 = vmor %vm565_vm15, %vm566_vm14 }
 0x254   : > { %v561_v21 = vmul.f32 %v846_v14, %v560_v16  ;;  %v550_v22 = vmul.f32 %v848_v19, %v545_v9  ;;  %v584_v24 = vmul.f32 %v844_v8, %v583_v15  ;;  %vm556_vm0 = vweird.f32 %v848_v19 }
 0x255   : > { %vm557_vm3 = vmor %vm555_vm2, %vm556_vm0 }
 0x256   : > { %v562_v27 = vmul.f32 0.5, %v561_v21  ;;  %v551_v28 = vmul.f32 %v848_v19, %v550_v22  ;;  %v588_v32 = vsel %vm587_vm13, %v844_v8, %v584_v24 }
 0x257   : > { %v592_v33 = vmul.f32 %v588_v32, %v544_v25 }
 0x258   : > { %v563_v34 = vsub.f32 1.5, %v562_v27  ;;  %v552_v35 = vmul.f32 0.5, %v551_v28 }
 0x259   : > { %v596_v37 = vmax.f32 %v592_v33, 0.0  ;;  %v617_v57 = vpop.permute.xlu0 %616 }
 0x25a   : > { %v553_v38 = vsub.f32 1.5, %v552_v35  ;;  %v564_v23 = vmul.f32 %v846_v14, %v563_v34 }
 0x25b   : > { %v598_v39 = vpack.c.bf16 %v596_v37, %v595_v36 }
 0x25c   : > { %v554_v30 = vmul.f32 %v848_v19, %v553_v38  ;;  %v568_v40 = vsel %vm567_vm1, %v846_v14, %v564_v23  ;;  %v612_v51 = vpop.permute.xlu1 %611 }
 0x25d   : > { %642 = vmatpush.bf16.msra.mxu1 %v598_v39  ;;  %784 = vmatpush.bf16.msra.mxu2 %v598_v39  ;;  %v590_v42 = vmul.f32 %v568_v40, %v542_v31 }
 0x25e   : > { %v558_v43 = vsel %vm557_vm3, %v848_v19, %v554_v30 }
 0x25f   : > { %v589_v44 = vmul.f32 %v558_v43, %v541_v41  ;;  %v594_v46 = vmax.f32 %v590_v42, 0.0 }
 0x261   : > { %v593_v45 = vmax.f32 %v589_v44, 0.0 }
 0x263   : > { %v597_v47 = vpack.c.bf16 %v594_v46, %v593_v45 }
 0x265   : > { %643 = vmatpush.bf16.msra.mxu1 %v597_v47  ;;  %785 = vmatpush.bf16.msra.mxu2 %v597_v47 }
 0x268   : > { %771 = vmatmul.msk.bf16.vlgmr.msra.gmra.mxu1 %vm629_vm4, %v780_v29  ;;  %772 = vmatmul.msk.bf16.vlgmr.msra.gmra.mxu2 %vm629_vm4, %v781_v48 }
 0x2e5   : > { %v645_v49 = vpop.f32.mrf.mxu1 }
 0x2e6   : > { %v646_v50 = vadd.f32 %v645_v49, %v602_v18 }
 0x2e8   : > { %655 = vst [vmem:[%s307_s19] sm:$0xff] %v646_v50 }
 0x2eb   : > { %v650_v52 = vpop.f32.mrf.mxu2 }
 0x2ec   : > { %v651_v53 = vadd.f32 %v650_v52, %v612_v51 }
 0x2ed   : > { %v647_v55 = vpop.f32.mrf.mxu1 }
 0x2ee   : > { %657 = vst [vmem:[%s307_s19 + $0x10] sm:$0xff] %v651_v53  ;;  %v648_v56 = vadd.f32 %v647_v55, %v607_v54 }
 0x2f0   : > { %656 = vst [vmem:[%s307_s19 + $0x8] sm:$0xff] %v648_v56 }
 0x2f3   : > { %v652_v58 = vpop.f32.mrf.mxu2 }
 0x2f4   : > { %v653_v59 = vadd.f32 %v652_v58, %v617_v57 }
 0x2f6   : > { %658 = vst [vmem:[%s307_s19 + $0x18] sm:$0xff] %v653_v59 }
 0x2f7   : > { %876 = shalt.err (!%p873_p3)
}
 0x2f8   : > { %s917_s18 = smov 128   ;;  %s918_s19 = smov 8  }
 0x2f9   : > { %786 = dma.vmem_to_hbm [thread:$0]  (%p1002_p5), %s673_s25, 512, %s675_s26, %s660_s9, %s917_s18, %s917_s18, %s918_s19  }
 0x2fa PF: > { %p792_p4 = scmp.ge.s32.totalorder %s911_s30, 2  ;;  %s689_s23 = sand.u32 1, %s899_s27  }
 0x2fb   : > { %s690_s24 = scalar_lea.sflag [#allocation3], %s689_s23 }
 0x2fc   : > { %p789_p7 = pnand %p792_p4, %p1006_p6 }
 0x2fe   : > { %p790_p8 = pneg %p789_p7 }
 0x300   : > { %894 = dma.done.wait (%p790_p8), %s690_s24, 512  }
 0x301   : > { %896 = vsyncadd (%p790_p8), %s690_s24, 4294966784  ;;  %p18_p9 = scmp.ge.s32.totalorder %s989_s11, 4   ;;  %s1145_s27 = smov %s903_s28 }
 0x302   : > { %s1146_s28 = smov %s907_s29  ;;  %s1147_s29 = smov %s1000_s14 }
 0x303   : > { %s1148_s30 = smov %s989_s11  ;;  %20 = sbr.rel (!%p18_p9) target bundleno = 3 (0x3), region = 90 }
 0x308   :  { %696 = vsyncpa [#allocation3], 1 }
 0x309   :  { %698 = vsyncpa [#allocation3 + $0x1], 1 }

</bundles_post_ra>
